<compile_context>
chip_gen: v7x
topology: tpu7x:2x2x1
jax: 0.10.0
libtpu: 0.0.40
codegen_flags: <defaults>
</compile_context>

<pallas_src>
import functools

import jax
import jax.numpy as jnp
from jax.experimental import pallas as pl
from jax.experimental.pallas import tpu as pltpu

NUM_NEURONS = 64
UV_DIM = 2
T_DIM = 1
INPUT_DIM = UV_DIM + T_DIM      # 3
OUTPUT_DIM = 3
MAX_TILE_N = 2048               # upper bound on lane (batch) columns per grid step


def _mxu_replication():
    """How many batch sub-groups to pack block-diagonally (fills the MXU width).

    v6e / v7x have 256x256 MXUs -> 4x;  v5e (and older 128x128-MXU chips) -> 2x.
    A wrong guess only costs performance, never correctness.
    """
    try:
        kind = jax.devices()[0].device_kind.lower()
    except Exception:
        return 4
    if ("v6" in kind) or ("v7" in kind) or ("6e" in kind) or ("7x" in kind):
        return 4
    return 2


_R = _mxu_replication()


def _choose_tile_n(n, r):
    """Lane-tile width: large enough to amortize per-step overhead, a multiple of r*128,
    small enough to keep the grid length >= 2 (v7x's two TensorCores) when N allows."""
    g = r * 128
    half = -(-n // 2)
    tile = -(-half // g) * g
    return int(max(g, min(MAX_TILE_N, tile)))


def _softplus(y):
    # Matches torch.nn.functional.softplus (beta=1, threshold=20).
    return jnp.where(y > 20.0, y, jnp.log1p(jnp.exp(jnp.minimum(y, 20.0))))


def residual_mlp_kernel(uv_ref, t_ref,
                        w1uv_ref, w1t_ref, b1_ref,
                        w23_ref, b23_ref,
                        w4_ref, b4_ref,
                        o_ref, h_sc,
                        *, r, tile_g):
    """Fused 4-layer MLP + softplus on one (.., TILE_N) batch tile.

    Per-step shapes (TILE_N = r * tile_g):
      uv_ref (2, TILE_N)   t_ref (1, TILE_N)   o_ref (3, TILE_N)
      w1uv (64, 2)  w1t (64, 1)  b1 (64, 1)                          [f32]
      w23  (2, r*64, r*64)  block-diagonal W2 / W3                   [bf16]
      b23  (2, r*64, 1)     tiled biases                             [f32]
      w4   (3, 64)  b4 (3, 1)                                        [f32]
      h_sc (r*64, tile_g)   VMEM scratch: r batch sub-groups stacked on contraction axis
    """
    # ---- Layer 1 over the whole tile (split-K over uv/t; contraction dims are tiny) ----
    h1 = (jnp.dot(w1uv_ref[...], uv_ref[...], preferred_element_type=jnp.float32)
          + jnp.dot(w1t_ref[...], t_ref[...], preferred_element_type=jnp.float32)
          + b1_ref[...])
    h1 = jnp.maximum(h1, 0.0)                                          # (64, TILE_N)

    # ---- Stack r batch sub-groups along the sublane/contraction axis (vreg-aligned:
    #      tile_g is a multiple of 128 lanes, 64 is a multiple of 8 sublanes) ----
    for g in range(r):
        h_sc[g * NUM_NEURONS:(g + 1) * NUM_NEURONS, :] = (
            h1[:, g * tile_g:(g + 1) * tile_g])
    h = h_sc[...]                                                      # (r*64, tile_g) f32

    # ---- Layers 2 & 3: block-diag weights -> full MXU width; bf16 operands, f32 accum ----
    for layer in range(2):
        h = (jnp.dot(w23_ref[layer], h.astype(jnp.bfloat16),
                     preferred_element_type=jnp.float32) + b23_ref[layer])
        h = jnp.maximum(h, 0.0)                                        # (r*64, tile_g)

    # ---- Layer 4 + softplus, per sub-group, back into the lane-dense (3, TILE_N) block ----
    w4 = w4_ref[...]
    b4 = b4_ref[...]
    for g in range(r):
        y = jnp.dot(w4, h[g * NUM_NEURONS:(g + 1) * NUM_NEURONS, :],
                    preferred_element_type=jnp.float32) + b4           # (3, tile_g)
        o_ref[:, g * tile_g:(g + 1) * tile_g] = _softplus(y).astype(o_ref.dtype)


@jax.jit
def residual_estimator_forward(uv, t, params):
    """uv: (N, 2) f32, t: (N, 1) f32 -> (N, 3) f32 = softplus(MLP(hstack(uv, t)))."""
    n = uv.shape[0]
    r = _R
    tile_n = _choose_tile_n(n, r)
    tile_g = tile_n // r

    # Feature-major so the batch dim rides the lane axis in-kernel.
    uv_f = uv.astype(jnp.float32).T                                    # (2, N)
    t_f = t.astype(jnp.float32).T                                      # (1, N)

    n_pad = pl.cdiv(n, tile_n) * tile_n
    if n_pad != n:
        # Kernel is strongly compute-bound (~700 flop/byte); this pad pass is noise.
        uv_f = jnp.pad(uv_f, ((0, 0), (0, n_pad - n)))
        t_f = jnp.pad(t_f, ((0, 0), (0, n_pad - n)))

    w1, b1, w2, b2, w3, b3, w4, b4 = params                            # (out, in) layout
    w1_uv = w1[:, :UV_DIM]                                             # (64, 2)
    w1_t = w1[:, UV_DIM:]                                              # (64, 1)

    # Block-diagonal replication of the two hidden layers (+ tiled biases), packed into
    # single operands; bf16 for the MXU, f32 biases.
    eye_r = jnp.eye(r, dtype=jnp.float32)
    w23 = jnp.stack([jnp.kron(eye_r, w2),
                     jnp.kron(eye_r, w3)]).astype(jnp.bfloat16)        # (2, r*64, r*64)
    b23 = jnp.stack([jnp.tile(b2, (r, 1)),
                     jnp.tile(b3, (r, 1))])                            # (2, r*64, 1) f32

    grid = (n_pad // tile_n,)
    full2 = lambda shape: pl.BlockSpec(shape, lambda i: (0, 0))        # whole (small) array
    full3 = lambda shape: pl.BlockSpec(shape, lambda i: (0, 0, 0))

    flops = 2 * n_pad * (INPUT_DIM * NUM_NEURONS
                         + 2 * NUM_NEURONS * NUM_NEURONS
                         + NUM_NEURONS * OUTPUT_DIM)
    weight_bytes = (2 * 2 * (r * NUM_NEURONS) ** 2                     # bf16 W2/W3 block-diag
                    + 4 * (NUM_NEURONS * (UV_DIM + T_DIM + 1)
                           + 2 * r * NUM_NEURONS
                           + OUTPUT_DIM * (NUM_NEURONS + 1)))
    cost = pl.CostEstimate(
        flops=flops,
        transcendentals=2 * OUTPUT_DIM * n_pad,                        # exp + log1p per output
        bytes_accessed=4 * n_pad * (INPUT_DIM + OUTPUT_DIM) + weight_bytes)

    kernel = functools.partial(residual_mlp_kernel, r=r, tile_g=tile_g)

    out = pl.pallas_call(
        kernel,
        out_shape=jax.ShapeDtypeStruct((OUTPUT_DIM, n_pad), jnp.float32),
        grid_spec=pltpu.PrefetchScalarGridSpec(
            num_scalar_prefetch=0,
            grid=grid,
            in_specs=[
                pl.BlockSpec((UV_DIM, tile_n), lambda i: (0, i)),      # uv tile (2, TILE_N)
                pl.BlockSpec((T_DIM, tile_n), lambda i: (0, i)),       # t tile  (1, TILE_N)
                full2((NUM_NEURONS, UV_DIM)),                          # W1_uv
                full2((NUM_NEURONS, T_DIM)),                           # W1_t
                full2((NUM_NEURONS, 1)),                               # b1
                full3((2, r * NUM_NEURONS, r * NUM_NEURONS)),          # W2/W3 block-diag (bf16)
                full3((2, r * NUM_NEURONS, 1)),                        # b2/b3 tiled
                full2((OUTPUT_DIM, NUM_NEURONS)),                      # W4
                full2((OUTPUT_DIM, 1)),                                # b4
            ],
            out_specs=pl.BlockSpec((OUTPUT_DIM, tile_n), lambda i: (0, i)),
            scratch_shapes=[pltpu.VMEM((r * NUM_NEURONS, tile_g), jnp.float32)],
        ),
        compiler_params=pltpu.CompilerParams(
            dimension_semantics=("parallel",)),                        # shard tiles on v7x's 2 TCs
        cost_estimate=cost,
    )(uv_f, t_f, w1_uv, w1_t, b1, w23, b23, w4, b4)

    return out[:, :n].T                                                # back to (N, 3)


def init_params(key):
    """Deterministic init of the 4 Linear layers, PyTorch (out_features, in_features) layout."""
    dims = [(INPUT_DIM, NUM_NEURONS),
            (NUM_NEURONS, NUM_NEURONS),
            (NUM_NEURONS, NUM_NEURONS),
            (NUM_NEURONS, OUTPUT_DIM)]
    params = []
    for (fan_in, fan_out) in dims:
        key, kw, kb = jax.random.split(key, 3)
        bound = 1.0 / jnp.sqrt(fan_in)  # PyTorch nn.Linear default uniform bound
        w = jax.random.uniform(kw, (fan_out, fan_in), jnp.float32, -bound, bound)
        b = jax.random.uniform(kb, (fan_out, 1), jnp.float32, -bound, bound)
        params += [w, b]
    return tuple(params)


def reference_forward(uv, t, params):
    """Plain-JAX f32 reference (matches torch.hstack + Sequential + softplus)."""
    x = jnp.concatenate([uv, t], axis=1).astype(jnp.float32)           # (N, 3)
    w1, b1, w2, b2, w3, b3, w4, b4 = params
    h = jnp.maximum(x @ w1.T + b1.T, 0.0)
    h = jnp.maximum(h @ w2.T + b2.T, 0.0)
    h = jnp.maximum(h @ w3.T + b3.T, 0.0)
    y = h @ w4.T + b4.T
    return jnp.where(y > 20.0, y, jnp.log1p(jnp.exp(jnp.minimum(y, 20.0))))


if __name__ == "__main__":
    key = jax.random.PRNGKey(0)
    key, k_uv, k_t, k_p = jax.random.split(key, 4)

    N = 16
    uv = jax.random.uniform(k_uv, (N, 2), jnp.float32, -1.0, 1.0)
    t = jax.random.uniform(k_t, (N, 1), jnp.float32, 0.0, 1.0)
    params = init_params(k_p)

    out = residual_estimator_forward(uv, t, params)
    out = jax.block_until_ready(out)

    ref = reference_forward(uv, t, params)
    assert out.shape == (N, 3) and out.dtype == jnp.float32
    # Hidden layers 2/3 run with bf16 MXU operands (f32 accumulation) -> loosened tolerance.
    assert jnp.allclose(out, ref, atol=3e-2, rtol=3e-2), "mismatch vs reference"

    print("KERNEL_OK")
</pallas_src>

<mosaic_0001>
module attributes {stable_mosaic.version = 11 : i64} {
  func.func @residual_mlp_kernel(%arg0: i32, %arg1: memref<2x256xf32, #tpu.memory_space<vmem>>, %arg2: memref<1x256xf32, #tpu.memory_space<vmem>>, %arg3: memref<64x2xf32, #tpu.memory_space<vmem>>, %arg4: memref<64x1xf32, #tpu.memory_space<vmem>>, %arg5: memref<64x1xf32, #tpu.memory_space<vmem>>, %arg6: memref<2x128x128xbf16, #tpu.memory_space<vmem>>, %arg7: memref<2x128x1xf32, #tpu.memory_space<vmem>>, %arg8: memref<3x64xf32, #tpu.memory_space<vmem>>, %arg9: memref<3x1xf32, #tpu.memory_space<vmem>>, %arg10: memref<3x256xf32, #tpu.memory_space<vmem>>, %arg11: memref<128x128xf32, #tpu.memory_space<vmem>>) attributes {dimension_semantics = [#tpu.dimension_semantics<parallel>], iteration_bounds = array<i64: 1>, scalar_prefetch = 0 : i64, scratch_operands = 1 : i64, tpu.core_type = #tpu.core_type<tc>, window_params = [{transform_indices = @transform_0, window_bounds = array<i64: 2, 256>}, {transform_indices = @transform_1, window_bounds = array<i64: 1, 256>}, {pipeline_mode = #tpu.pipeline_mode<synchronous>, transform_indices = @transform_2, window_bounds = array<i64: 64, 2>}, {pipeline_mode = #tpu.pipeline_mode<synchronous>, transform_indices = @transform_3, window_bounds = array<i64: 64, 1>}, {pipeline_mode = #tpu.pipeline_mode<synchronous>, transform_indices = @transform_4, window_bounds = array<i64: 64, 1>}, {pipeline_mode = #tpu.pipeline_mode<synchronous>, transform_indices = @transform_5, window_bounds = array<i64: 2, 128, 128>}, {pipeline_mode = #tpu.pipeline_mode<synchronous>, transform_indices = @transform_6, window_bounds = array<i64: 2, 128, 1>}, {pipeline_mode = #tpu.pipeline_mode<synchronous>, transform_indices = @transform_7, window_bounds = array<i64: 3, 64>}, {pipeline_mode = #tpu.pipeline_mode<synchronous>, transform_indices = @transform_8, window_bounds = array<i64: 3, 1>}, {transform_indices = @transform_9, window_bounds = array<i64: 3, 256>}]} {
    %c0 = arith.constant 0 : index
    %c0_0 = arith.constant 0 : index
    %0 = vector.load %arg3[%c0, %c0_0] : memref<64x2xf32, #tpu.memory_space<vmem>>, vector<64x2xf32>
    %c0_1 = arith.constant 0 : index
    %c0_2 = arith.constant 0 : index
    %1 = vector.load %arg1[%c0_1, %c0_2] : memref<2x256xf32, #tpu.memory_space<vmem>>, vector<2x256xf32>
    %cst = arith.constant dense<0.000000e+00> : vector<64x256xf32>
    %2 = tpu.matmul %0, %1, %cst {dimension_numbers = #tpu.dot_dimension_numbers<[1], [0], [0], [1], [0, 0, 1, 1], [], []>} : vector<64x2xf32>, vector<2x256xf32>, vector<64x256xf32> -> vector<64x256xf32>
    %c0_3 = arith.constant 0 : index
    %c0_4 = arith.constant 0 : index
    %3 = vector.load %arg4[%c0_3, %c0_4] : memref<64x1xf32, #tpu.memory_space<vmem>>, vector<64x1xf32>
    %c0_5 = arith.constant 0 : index
    %c0_6 = arith.constant 0 : index
    %4 = vector.load %arg2[%c0_5, %c0_6] : memref<1x256xf32, #tpu.memory_space<vmem>>, vector<1x256xf32>
    %cst_7 = arith.constant dense<0.000000e+00> : vector<64x256xf32>
    %5 = tpu.matmul %3, %4, %cst_7 {dimension_numbers = #tpu.dot_dimension_numbers<[1], [0], [0], [1], [0, 0, 1, 1], [], []>} : vector<64x1xf32>, vector<1x256xf32>, vector<64x256xf32> -> vector<64x256xf32>
    %6 = arith.addf %2, %5 : vector<64x256xf32>
    %c0_8 = arith.constant 0 : index
    %c0_9 = arith.constant 0 : index
    %7 = vector.load %arg5[%c0_8, %c0_9] : memref<64x1xf32, #tpu.memory_space<vmem>>, vector<64x1xf32>
    %8 = vector.broadcast %7 : vector<64x1xf32> to vector<64x256xf32>
    %9 = arith.addf %6, %8 : vector<64x256xf32>
    %cst_10 = arith.constant 0.000000e+00 : f32
    %10 = vector.broadcast %cst_10 : f32 to vector<64x256xf32>
    %11 = arith.maximumf %9, %10 : vector<64x256xf32>
    %12 = vector.extract_strided_slice %11 {offsets = [0, 0], sizes = [64, 128], strides = [1, 1]} : vector<64x256xf32> to vector<64x128xf32>
    %c0_11 = arith.constant 0 : index
    %c0_12 = arith.constant 0 : index
    %13 = vector.load %arg11[%c0_11, %c0_12] : memref<128x128xf32, #tpu.memory_space<vmem>>, vector<64x128xf32>
    tpu.vector_store %arg11[%c0_11, %c0_12], %12 {strides = array<i32>} : memref<128x128xf32, #tpu.memory_space<vmem>>, vector<64x128xf32>,
    %14 = vector.extract_strided_slice %11 {offsets = [0, 128], sizes = [64, 128], strides = [1, 1]} : vector<64x256xf32> to vector<64x128xf32>
    %c64 = arith.constant 64 : index
    %c0_13 = arith.constant 0 : index
    %15 = vector.load %arg11[%c64, %c0_13] : memref<128x128xf32, #tpu.memory_space<vmem>>, vector<64x128xf32>
    tpu.vector_store %arg11[%c64, %c0_13], %14 {strides = array<i32>} : memref<128x128xf32, #tpu.memory_space<vmem>>, vector<64x128xf32>,
    %c0_14 = arith.constant 0 : index
    %c0_15 = arith.constant 0 : index
    %16 = vector.load %arg11[%c0_14, %c0_15] : memref<128x128xf32, #tpu.memory_space<vmem>>, vector<128x128xf32>
    %c0_16 = arith.constant 0 : index
    %c0_17 = arith.constant 0 : index
    %c0_18 = arith.constant 0 : index
    %17 = vector.load %arg6[%c0_16, %c0_17, %c0_18] : memref<2x128x128xbf16, #tpu.memory_space<vmem>>, vector<1x128x128xbf16>
    %18 = vector.shape_cast %17 : vector<1x128x128xbf16> to vector<128x128xbf16>
    %19 = arith.truncf %16 : vector<128x128xf32> to vector<128x128xbf16>
    %cst_19 = arith.constant dense<0.000000e+00> : vector<128x128xf32>
    %20 = tpu.matmul %18, %19, %cst_19 {dimension_numbers = #tpu.dot_dimension_numbers<[1], [0], [0], [1], [0, 0, 1, 1], [], []>} : vector<128x128xbf16>, vector<128x128xbf16>, vector<128x128xf32> -> vector<128x128xf32>
    %c0_20 = arith.constant 0 : index
    %c0_21 = arith.constant 0 : index
    %c0_22 = arith.constant 0 : index
    %21 = vector.load %arg7[%c0_20, %c0_21, %c0_22] : memref<2x128x1xf32, #tpu.memory_space<vmem>>, vector<1x128x1xf32>
    %22 = vector.shape_cast %21 : vector<1x128x1xf32> to vector<128x1xf32>
    %23 = vector.broadcast %22 : vector<128x1xf32> to vector<128x128xf32>
    %24 = arith.addf %20, %23 : vector<128x128xf32>
    %cst_23 = arith.constant 0.000000e+00 : f32
    %25 = vector.broadcast %cst_23 : f32 to vector<128x128xf32>
    %26 = arith.maximumf %24, %25 : vector<128x128xf32>
    %c1 = arith.constant 1 : index
    %c0_24 = arith.constant 0 : index
    %c0_25 = arith.constant 0 : index
    %27 = vector.load %arg6[%c1, %c0_24, %c0_25] : memref<2x128x128xbf16, #tpu.memory_space<vmem>>, vector<1x128x128xbf16>
    %28 = vector.shape_cast %27 : vector<1x128x128xbf16> to vector<128x128xbf16>
    %29 = arith.truncf %26 : vector<128x128xf32> to vector<128x128xbf16>
    %cst_26 = arith.constant dense<0.000000e+00> : vector<128x128xf32>
    %30 = tpu.matmul %28, %29, %cst_26 {dimension_numbers = #tpu.dot_dimension_numbers<[1], [0], [0], [1], [0, 0, 1, 1], [], []>} : vector<128x128xbf16>, vector<128x128xbf16>, vector<128x128xf32> -> vector<128x128xf32>
    %c1_27 = arith.constant 1 : index
    %c0_28 = arith.constant 0 : index
    %c0_29 = arith.constant 0 : index
    %31 = vector.load %arg7[%c1_27, %c0_28, %c0_29] : memref<2x128x1xf32, #tpu.memory_space<vmem>>, vector<1x128x1xf32>
    %32 = vector.shape_cast %31 : vector<1x128x1xf32> to vector<128x1xf32>
    %33 = vector.broadcast %32 : vector<128x1xf32> to vector<128x128xf32>
    %34 = arith.addf %30, %33 : vector<128x128xf32>
    %cst_30 = arith.constant 0.000000e+00 : f32
    %35 = vector.broadcast %cst_30 : f32 to vector<128x128xf32>
    %36 = arith.maximumf %34, %35 : vector<128x128xf32>
    %c0_31 = arith.constant 0 : index
    %c0_32 = arith.constant 0 : index
    %37 = vector.load %arg8[%c0_31, %c0_32] : memref<3x64xf32, #tpu.memory_space<vmem>>, vector<3x64xf32>
    %c0_33 = arith.constant 0 : index
    %c0_34 = arith.constant 0 : index
    %38 = vector.load %arg9[%c0_33, %c0_34] : memref<3x1xf32, #tpu.memory_space<vmem>>, vector<3x1xf32>
    %39 = vector.extract_strided_slice %36 {offsets = [0, 0], sizes = [64, 128], strides = [1, 1]} : vector<128x128xf32> to vector<64x128xf32>
    %cst_35 = arith.constant dense<0.000000e+00> : vector<3x128xf32>
    %40 = tpu.matmul %37, %39, %cst_35 {dimension_numbers = #tpu.dot_dimension_numbers<[1], [0], [0], [1], [0, 0, 1, 1], [], []>} : vector<3x64xf32>, vector<64x128xf32>, vector<3x128xf32> -> vector<3x128xf32>
    %41 = vector.broadcast %38 : vector<3x1xf32> to vector<3x128xf32>
    %42 = arith.addf %40, %41 : vector<3x128xf32>
    %cst_36 = arith.constant 2.000000e+01 : f32
    %43 = vector.broadcast %cst_36 : f32 to vector<3x128xf32>
    %44 = arith.cmpf ogt, %42, %43 : vector<3x128xf32>
    %cst_37 = arith.constant 2.000000e+01 : f32
    %45 = vector.broadcast %cst_37 : f32 to vector<3x128xf32>
    %46 = arith.minimumf %42, %45 : vector<3x128xf32>
    %47 = math.exp %46 : vector<3x128xf32>
    %48 = math.log1p %47 : vector<3x128xf32>
    %49 = arith.select %44, %42, %48 : vector<3x128xi1>, vector<3x128xf32>
    %c0_38 = arith.constant 0 : index
    %c0_39 = arith.constant 0 : index
    %50 = vector.load %arg10[%c0_38, %c0_39] : memref<3x256xf32, #tpu.memory_space<vmem>>, vector<3x128xf32>
    tpu.vector_store %arg10[%c0_38, %c0_39], %49 {strides = array<i32>} : memref<3x256xf32, #tpu.memory_space<vmem>>, vector<3x128xf32>,
    %51 = vector.extract_strided_slice %36 {offsets = [64, 0], sizes = [64, 128], strides = [1, 1]} : vector<128x128xf32> to vector<64x128xf32>
    %cst_40 = arith.constant dense<0.000000e+00> : vector<3x128xf32>
    %52 = tpu.matmul %37, %51, %cst_40 {dimension_numbers = #tpu.dot_dimension_numbers<[1], [0], [0], [1], [0, 0, 1, 1], [], []>} : vector<3x64xf32>, vector<64x128xf32>, vector<3x128xf32> -> vector<3x128xf32>
    %53 = vector.broadcast %38 : vector<3x1xf32> to vector<3x128xf32>
    %54 = arith.addf %52, %53 : vector<3x128xf32>
    %cst_41 = arith.constant 2.000000e+01 : f32
    %55 = vector.broadcast %cst_41 : f32 to vector<3x128xf32>
    %56 = arith.cmpf ogt, %54, %55 : vector<3x128xf32>
    %cst_42 = arith.constant 2.000000e+01 : f32
    %57 = vector.broadcast %cst_42 : f32 to vector<3x128xf32>
    %58 = arith.minimumf %54, %57 : vector<3x128xf32>
    %59 = math.exp %58 : vector<3x128xf32>
    %60 = math.log1p %59 : vector<3x128xf32>
    %61 = arith.select %56, %54, %60 : vector<3x128xi1>, vector<3x128xf32>
    %c0_43 = arith.constant 0 : index
    %c128 = arith.constant 128 : index
    %62 = vector.load %arg10[%c0_43, %c128] : memref<3x256xf32, #tpu.memory_space<vmem>>, vector<3x128xf32>
    tpu.vector_store %arg10[%c0_43, %c128], %61 {strides = array<i32>} : memref<3x256xf32, #tpu.memory_space<vmem>>, vector<3x128xf32>,
    return
  }
  func.func @transform_0(%arg0: i32) -> (i32, i32) {
    %c0_i32 = arith.constant 0 : i32
    %c0_i32_0 = arith.constant 0 : i32
    return %c0_i32, %arg0 : i32, i32
  }
  func.func @transform_1(%arg0: i32) -> (i32, i32) {
    %c0_i32 = arith.constant 0 : i32
    %c0_i32_0 = arith.constant 0 : i32
    return %c0_i32, %arg0 : i32, i32
  }
  func.func @transform_2(%arg0: i32) -> (i32, i32) {
    %c0_i32 = arith.constant 0 : i32
    %c0_i32_0 = arith.constant 0 : i32
    %c0_i32_1 = arith.constant 0 : i32
    return %c0_i32, %c0_i32_0 : i32, i32
  }
  func.func @transform_3(%arg0: i32) -> (i32, i32) {
    %c0_i32 = arith.constant 0 : i32
    %c0_i32_0 = arith.constant 0 : i32
    %c0_i32_1 = arith.constant 0 : i32
    return %c0_i32, %c0_i32_0 : i32, i32
  }
  func.func @transform_4(%arg0: i32) -> (i32, i32) {
    %c0_i32 = arith.constant 0 : i32
    %c0_i32_0 = arith.constant 0 : i32
    %c0_i32_1 = arith.constant 0 : i32
    return %c0_i32, %c0_i32_0 : i32, i32
  }
  func.func @transform_5(%arg0: i32) -> (i32, i32, i32) {
    %c0_i32 = arith.constant 0 : i32
    %c0_i32_0 = arith.constant 0 : i32
    %c0_i32_1 = arith.constant 0 : i32
    %c0_i32_2 = arith.constant 0 : i32
    return %c0_i32, %c0_i32_0, %c0_i32_1 : i32, i32, i32
  }
  func.func @transform_6(%arg0: i32) -> (i32, i32, i32) {
    %c0_i32 = arith.constant 0 : i32
    %c0_i32_0 = arith.constant 0 : i32
    %c0_i32_1 = arith.constant 0 : i32
    %c0_i32_2 = arith.constant 0 : i32
    return %c0_i32, %c0_i32_0, %c0_i32_1 : i32, i32, i32
  }
  func.func @transform_7(%arg0: i32) -> (i32, i32) {
    %c0_i32 = arith.constant 0 : i32
    %c0_i32_0 = arith.constant 0 : i32
    %c0_i32_1 = arith.constant 0 : i32
    return %c0_i32, %c0_i32_0 : i32, i32
  }
  func.func @transform_8(%arg0: i32) -> (i32, i32) {
    %c0_i32 = arith.constant 0 : i32
    %c0_i32_0 = arith.constant 0 : i32
    %c0_i32_1 = arith.constant 0 : i32
    return %c0_i32, %c0_i32_0 : i32, i32
  }
  func.func @transform_9(%arg0: i32) -> (i32, i32) {
    %c0_i32 = arith.constant 0 : i32
    %c0_i32_0 = arith.constant 0 : i32
    return %c0_i32, %arg0 : i32, i32
  }
}

</mosaic_0001>

<bundles_post_ra>
// kernel: residual_estimator_forward.1
= control target key start
LH: loop header
LB: loop body
LE: loop exit
PB: predicated region body
PF: predicated region fallthrough
CT: control target
= control target key end

     0   :  { %v52_v0 = vlaneseq  ;;  %v1509_v1 = vmov 0.0   ;;  %v1510_v5 = vmov 0   ;;  %vm85_vm0 = vcmask 1040384   ;;  %s1843_s1 = inlined_call_operand.vmem [shape: f32[1,256], index: 1, kind: input, shape index: {}]   ;;  %s1844_s0 = inlined_call_operand.vmem [shape: f32[2,256], index: 0, kind: input, shape index: {}]   ;;  %s1845_s4 = inlined_call_operand.vmem [shape: f32[64,1], index: 4, kind: input, shape index: {}]   ;;  %s1846_s3 = inlined_call_operand.vmem [shape: f32[64,1], index: 3, kind: input, shape index: {}]   ;;  %s1847_s6 = inlined_call_operand.vmem [shape: f32[2,128,1], index: 6, kind: input, shape index: {}]   ;;  %s1848_s2 = inlined_call_operand.vmem [shape: f32[64,2], index: 2, kind: input, shape index: {}]   ;;  %s1849_s8 = inlined_call_operand.vmem [shape: f32[3,1], index: 8, kind: input, shape index: {}]   ;;  %s1850_s5 = inlined_call_operand.vmem [shape: bf16[2,128,128], index: 5, kind: input, shape index: {}]   ;;  %s1851_s7 = inlined_call_operand.vmem [shape: f32[3,64], index: 7, kind: input, shape index: {}]   ;;  %s1852_s9 = inlined_call_operand.vmem [shape: f32[3,256], index: 9, kind: output, shape index: {}]  }
   0x1   :  { %154 = vmatprep.mubr.f32.mxu0 %v1509_v1  ;;  %v50_v3 = vld [vmem:[%s1843_s1] sm:$0x3]  ;;  %1483 = vset.pattern.permute.xlu0 %v1510_v5  ;;  %vm60_vm1 = vcmask 7168   ;;  %vm237_vm2 = vcmask 1041408   ;;  %v357_v13 = vld [vmem:[%s1845_s4 + $0x10] sm:$0xff]  ;;  %v356_v14 = vld [vmem:[%s1845_s4 + $0x8] sm:$0xff] }
   0x2   :  { %v53_v2 = vshrl.u32 %v52_v0, 7  ;;  %v1226_v4 = vld.sshfl [vmem:[%s1844_s0] sm:$0x33 pattern:$0x76325410]  ;;  %1484 = vset.pattern.permute.xlu1 %v1510_v5  ;;  %v358_v15 = vld [vmem:[%s1845_s4 + $0x18] sm:$0xff] }
   0x3   :  { %v355_v8 = vld [vmem:[%s1845_s4] sm:$0xff]  ;;  %v211_v11 = vcombine.high %v1226_v4, %v1226_v4  ;;  %375 = vperm.xlu1 %1484, %v357_v13   ;;  %v43_v16 = vld [vmem:[%s1846_s3 + $0x8] sm:$0xff]  ;;  %v44_v19 = vld [vmem:[%s1846_s3 + $0x10] sm:$0xff]  ;;  %vm212_vm3 = vcmask 15360   ;;  %vm1512_vm4 = vmmov 0   ;;  %vm1038_vm5 = vcmask 523264  }
   0x4   :  { %v54_v6 = vsub.s32 0, %v53_v2  ;;  %v58_v7 = vsub.s32 1, %v53_v2  ;;  %365 = vperm.xlu0 %1483, %v355_v8   ;;  %v42_v12 = vld [vmem:[%s1846_s3] sm:$0xff]  ;;  %v360_v18 = vld [vmem:[%s1845_s4 + $0x28] sm:$0xff]  ;;  %v361_v20 = vld [vmem:[%s1845_s4 + $0x30] sm:$0xff] }
   0x5   :  { %v359_v17 = vld [vmem:[%s1845_s4 + $0x20] sm:$0xff]  ;;  %v362_v21 = vld [vmem:[%s1845_s4 + $0x38] sm:$0xff]  ;;  %v492_v24 = vld [vmem:[%s1847_s6 + $0x8] sm:$0xff] }
   0x6   :  { %v55_v9 = vrot.slane %v50_v3, %v54_v6  ;;  %v59_v10 = vrot.slane %v50_v3, %v58_v7  ;;  %v45_v22 = vld [vmem:[%s1846_s3 + $0x18] sm:$0xff]  ;;  %v491_v23 = vld [vmem:[%s1847_s6] sm:$0xff]  ;;  %v493_v26 = vld [vmem:[%s1847_s6 + $0x10] sm:$0xff] }
   0x7   :  { %380 = vperm.xlu1 %1484, %v358_v15   ;;  %v46_v25 = vld [vmem:[%s1846_s3 + $0x20] sm:$0xff]  ;;  %v494_v27 = vld [vmem:[%s1847_s6 + $0x18] sm:$0xff]  ;;  %v47_v28 = vld [vmem:[%s1846_s3 + $0x28] sm:$0xff] }
   0x8   :  { %1216 = vmatprep.subr.msk.mxu0 %vm85_vm0, %v59_v10  ;;  %370 = vperm.xlu0 %1483, %v356_v14   ;;  %v495_v29 = vld [vmem:[%s1847_s6 + $0x20] sm:$0xff]  ;;  %v496_v30 = vld [vmem:[%s1847_s6 + $0x28] sm:$0xff]  ;;  %v48_v31 = vld [vmem:[%s1846_s3 + $0x30] sm:$0xff] }
   0x9   :  { %1217 = vmatpush1.msk.msra.mxu0 %vm85_vm0, %v55_v9  ;;  %v497_v32 = vld [vmem:[%s1847_s6 + $0x30] sm:$0xff]  ;;  %v498_v33 = vld [vmem:[%s1847_s6 + $0x38] sm:$0xff]  ;;  %v499_v35 = vld [vmem:[%s1847_s6 + $0x40] sm:$0xff] }
   0xa   :  { %1218 = vmatmul.mubr.msk.f32.vlgmr.msra.gmra.mrb[0].mxu0 %vm60_vm1, %v42_v12  ;;  %1227 = vmatprep.subr.msk.mxu0 %vm237_vm2, %v211_v11  ;;  %v49_v34 = vld [vmem:[%s1846_s3 + $0x38] sm:$0xff]  ;;  %v500_v36 = vld [vmem:[%s1847_s6 + $0x48] sm:$0xff]  ;;  %v33_v37 = vld [vmem:[%s1848_s2] sm:$0xff] }
   0xb   :  { %160 = vmatprep.mubr.f32.mxu0 %v1509_v1  ;;  %1228 = vmatpush1.msk.msra.mxu0 %vm237_vm2, %v1226_v4  ;;  %v501_v38 = vld [vmem:[%s1847_s6 + $0x50] sm:$0xff]  ;;  %v502_v39 = vld [vmem:[%s1847_s6 + $0x58] sm:$0xff]  ;;  %v34_v40 = vld [vmem:[%s1848_s2 + $0x8] sm:$0xff] }
   0xc   :  { %385 = vperm.xlu0 %1483, %v359_v17   ;;  %390 = vperm.xlu1 %1484, %v360_v18   ;;  %v503_v41 = vld [vmem:[%s1847_s6 + $0x60] sm:$0xff]  ;;  %v504_v42 = vld [vmem:[%s1847_s6 + $0x68] sm:$0xff]  ;;  %v35_v43 = vld [vmem:[%s1848_s2 + $0x10] sm:$0xff] }
   0xd   :  { %v505_v44 = vld [vmem:[%s1847_s6 + $0x70] sm:$0xff]  ;;  %v506_v45 = vld [vmem:[%s1847_s6 + $0x78] sm:$0xff]  ;;  %v1261_v47 = vld [vmem:[%s1847_s6 + $0x80] sm:$0xff] }
   0xe   :  { %1219 = vmatmul.mubr.msk.f32.gmra.mrb[2].mxu0 %vm60_vm1, %v43_v16  ;;  %v36_v46 = vld [vmem:[%s1848_s2 + $0x18] sm:$0xff]  ;;  %v1262_v48 = vld [vmem:[%s1847_s6 + $0x88] sm:$0xff]  ;;  %v37_v49 = vld [vmem:[%s1848_s2 + $0x20] sm:$0xff] }
   0xf   :  { %166 = vmatprep.mubr.f32.mxu0 %v1509_v1  ;;  %v1263_v50 = vld [vmem:[%s1847_s6 + $0x90] sm:$0xff]  ;;  %v1264_v51 = vld [vmem:[%s1847_s6 + $0x98] sm:$0xff]  ;;  %v38_v52 = vld [vmem:[%s1848_s2 + $0x28] sm:$0xff] }
  0x10   :  { %395 = vperm.xlu0 %1483, %v361_v20   ;;  %400 = vperm.xlu1 %1484, %v362_v21   ;;  %v1265_v53 = vld [vmem:[%s1847_s6 + $0xa0] sm:$0xff]  ;;  %v1266_v54 = vld [vmem:[%s1847_s6 + $0xa8] sm:$0xff]  ;;  %v39_v55 = vld [vmem:[%s1848_s2 + $0x30] sm:$0xff] }
  0x11   :  { %v1267_v56 = vld [vmem:[%s1847_s6 + $0xb0] sm:$0xff]  ;;  %v1268_v57 = vld [vmem:[%s1847_s6 + $0xb8] sm:$0xff]  ;;  %v1269_v59 = vld [vmem:[%s1847_s6 + $0xc0] sm:$0xff] }
  0x12   :  { %1220 = vmatmul.mubr.msk.f32.gmra.mrb[4].mxu0 %vm60_vm1, %v44_v19  ;;  %v40_v58 = vld [vmem:[%s1848_s2 + $0x38] sm:$0xff]  ;;  %v1270_v60 = vld [vmem:[%s1847_s6 + $0xc8] sm:$0xff]  ;;  %v1271_v61 = vld [vmem:[%s1847_s6 + $0xd0] sm:$0xff] }
  0x13   :  { %172 = vmatprep.mubr.f32.mxu0 %v1509_v1  ;;  %v1272_v62 = vld [vmem:[%s1847_s6 + $0xd8] sm:$0xff]  ;;  %v1273_v63 = vld [vmem:[%s1847_s6 + $0xe0] sm:$0xff]  ;;  %v1274_v0 = vld [vmem:[%s1847_s6 + $0xe8] sm:$0xff] }
  0x14   :  { %509 = vperm.xlu0 %1483, %v491_v23   ;;  %514 = vperm.xlu1 %1484, %v492_v24   ;;  %v1275_v2 = vld [vmem:[%s1847_s6 + $0xf0] sm:$0xff]  ;;  %v1276_v3 = vld [vmem:[%s1847_s6 + $0xf8] sm:$0xff]  ;;  %v1032_v4 = vld [vmem:[%s1849_s8] sm:$0x7] }
  0x15   :  { %v1485_v5 = vld [vmem:[%s1850_s5] sm:$0xff]  }
  0x16   :  { %1221 = vmatmul.mubr.msk.f32.gmra.mrb[6].mxu0 %vm60_vm1, %v45_v22  ;;  %1353 = vmatprep.mubr.bf16.mxu1 %v1485_v5 }
  0x17   :  { %178 = vmatprep.mubr.f32.mxu0 %v1509_v1 }
  0x18   :  { %519 = vperm.xlu0 %1483, %v493_v26   ;;  %524 = vperm.xlu1 %1484, %v494_v27  }
  0x1a   :  { %1222 = vmatmul.mubr.msk.f32.gmra.mrb[8].mxu0 %vm60_vm1, %v46_v25 }
  0x1b   :  { %184 = vmatprep.mubr.f32.mxu0 %v1509_v1 }
  0x1c   :  { %529 = vperm.xlu0 %1483, %v495_v29   ;;  %534 = vperm.xlu1 %1484, %v496_v30  }
  0x1e   :  { %1223 = vmatmul.mubr.msk.f32.gmra.mrb[10].mxu0 %vm60_vm1, %v47_v28 }
  0x1f   :  { %190 = vmatprep.mubr.f32.mxu0 %v1509_v1 }
  0x20   :  { %539 = vperm.xlu0 %1483, %v497_v32   ;;  %544 = vperm.xlu1 %1484, %v498_v33  }
  0x22   :  { %1224 = vmatmul.mubr.msk.f32.gmra.mrb[12].mxu0 %vm60_vm1, %v48_v31 }
  0x23   :  { %196 = vmatprep.mubr.f32.mxu0 %v1509_v1 }
  0x24   :  { %549 = vperm.xlu0 %1483, %v499_v35   ;;  %554 = vperm.xlu1 %1484, %v500_v36  }
  0x26   :  { %1225 = vmatmul.mubr.msk.f32.gmra.mrb[14].mxu0 %vm60_vm1, %v49_v34 }
  0x27   :  { %306 = vmatprep.mubr.f32.mxu0 %v1509_v1 }
  0x28   :  { %559 = vperm.xlu0 %1483, %v501_v38   ;;  %564 = vperm.xlu1 %1484, %v502_v39  }
  0x2a   :  { %1229 = vmatmul.mubr.msk.f32.vlgmr.msra.gmra.mrb[0].mxu0 %vm212_vm3, %v33_v37 }
  0x2b   :  { %312 = vmatprep.mubr.f32.mxu0 %v1509_v1 }
  0x2c   :  { %569 = vperm.xlu0 %1483, %v503_v41   ;;  %574 = vperm.xlu1 %1484, %v504_v42  }
  0x2e   :  { %1230 = vmatmul.mubr.msk.f32.gmra.mrb[2].mxu0 %vm212_vm3, %v34_v40 }
  0x2f   :  { %318 = vmatprep.mubr.f32.mxu0 %v1509_v1 }
  0x30   :  { %579 = vperm.xlu0 %1483, %v505_v44   ;;  %584 = vperm.xlu1 %1484, %v506_v45  }
  0x32   :  { %1231 = vmatmul.mubr.msk.f32.gmra.mrb[4].mxu0 %vm212_vm3, %v35_v43 }
  0x33   :  { %324 = vmatprep.mubr.f32.mxu0 %v1509_v1 }
  0x34   :  { %792 = vperm.xlu0 %1483, %v1261_v47   ;;  %797 = vperm.xlu1 %1484, %v1262_v48  }
  0x36   :  { %1232 = vmatmul.mubr.msk.f32.gmra.mrb[6].mxu0 %vm212_vm3, %v36_v46 }
  0x37   :  { %330 = vmatprep.mubr.f32.mxu0 %v1509_v1 }
  0x38   :  { %802 = vperm.xlu0 %1483, %v1263_v50   ;;  %807 = vperm.xlu1 %1484, %v1264_v51  }
  0x3a   :  { %1233 = vmatmul.mubr.msk.f32.gmra.mrb[8].mxu0 %vm212_vm3, %v37_v49 }
  0x3b   :  { %336 = vmatprep.mubr.f32.mxu0 %v1509_v1 }
  0x3c   :  { %812 = vperm.xlu0 %1483, %v1265_v53   ;;  %817 = vperm.xlu1 %1484, %v1266_v54  }
  0x3e   :  { %1234 = vmatmul.mubr.msk.f32.gmra.mrb[10].mxu0 %vm212_vm3, %v38_v52 }
  0x3f   :  { %342 = vmatprep.mubr.f32.mxu0 %v1509_v1 }
  0x40   :  { %822 = vperm.xlu0 %1483, %v1267_v56   ;;  %827 = vperm.xlu1 %1484, %v1268_v57  }
  0x42   :  { %1235 = vmatmul.mubr.msk.f32.gmra.mrb[12].mxu0 %vm212_vm3, %v39_v55 }
  0x43   :  { %348 = vmatprep.mubr.f32.mxu0 %v1509_v1 }
  0x44   :  { %832 = vperm.xlu0 %1483, %v1269_v59   ;;  %837 = vperm.xlu1 %1484, %v1270_v60  }
  0x46   :  { %1236 = vmatmul.mubr.msk.f32.gmra.mrb[14].mxu0 %vm212_vm3, %v40_v58 }
  0x47   :  { %1417 = vmatprep.mubr.msk.f32.mxu0 %vm1512_vm4, %v1509_v1 }
  0x48   :  { %842 = vperm.xlu0 %1483, %v1271_v61   ;;  %847 = vperm.xlu1 %1484, %v1272_v62  }
  0x4c   :  { %852 = vperm.xlu0 %1483, %v1273_v63   ;;  %857 = vperm.xlu1 %1484, %v1274_v0  }
  0x50   :  { %862 = vperm.xlu0 %1483, %v1275_v2   ;;  %867 = vperm.xlu1 %1484, %v1276_v3  }
  0x54   :  { %1035 = vperm.xlu0 %1483, %v1032_v4  }
  0x82   :  { %v376_v15 = vpop.permute.xlu1 %375 }
  0x83   :  { %v366_v6 = vpop.permute.xlu0 %365 }
  0x86   :  { %v381_v26 = vpop.permute.xlu1 %380 }
  0x87   :  { %v371_v10 = vpop.permute.xlu0 %370 }
  0x8b   :  { %v386_v39 = vpop.permute.xlu0 %385  ;;  %v391_v42 = vpop.permute.xlu1 %390 }
  0x8f   :  { %v396_v55 = vpop.permute.xlu0 %395  ;;  %v401_v58 = vpop.permute.xlu1 %400 }
  0xfd   :  { %v308_v7 = vpop.f32.mrb[0].mxu0 }
  0xfe   :  { %v310_v8 = vpop.f32.mrb[1].mxu0  ;;  %v403_v9 = vadd.f32 %v366_v6, %v308_v7  ;;  %v1486_v7 = vld [vmem:[%s1850_s5 + $0x8] sm:$0xff]  }
  0xff   :  { %v404_v11 = vadd.f32 %v366_v6, %v310_v8  ;;  %v1487_v8 = vld [vmem:[%s1850_s5 + $0x10] sm:$0xff]  }
 0x100   :  { %v419_v17 = vmax.f32 %v403_v9, 0.0  ;;  %v1488_v9 = vld [vmem:[%s1850_s5 + $0x18] sm:$0xff]  }
 0x101   :  { %v314_v12 = vpop.f32.mrb[2].mxu0  ;;  %v420_v19 = vmax.f32 %v404_v11, 0.0  ;;  %v1490_v11 = vld [vmem:[%s1850_s5 + $0x28] sm:$0xff]  }
 0x102   :  { %v405_v13 = vadd.f32 %v371_v10, %v314_v12  ;;  %v316_v14 = vpop.f32.mrb[3].mxu0  ;;  %v1491_v12 = vld [vmem:[%s1850_s5 + $0x30] sm:$0xff]  }
 0x103   :  { %v406_v16 = vadd.f32 %v371_v10, %v316_v14  ;;  %v1489_v10 = vld [vmem:[%s1850_s5 + $0x20] sm:$0xff]  }
 0x104   :  { %v421_v18 = vmax.f32 %v405_v13, 0.0  ;;  %v1492_v13 = vld [vmem:[%s1850_s5 + $0x38] sm:$0xff]   ;;  %v1493_v14 = vld [vmem:[%s1850_s5 + $0x40] sm:$0xff]  }
 0x105   :  { %v422_v20 = vmax.f32 %v406_v16, 0.0  ;;  %v320_v21 = vpop.f32.mrb[4].mxu0  ;;  %v515_v16 = vpop.permute.xlu1 %514 }
 0x106   :  { %v322_v22 = vpop.f32.mrb[5].mxu0  ;;  %v483_v23 = vpack.c.bf16 %v421_v18, %v419_v17  ;;  %v407_v25 = vadd.f32 %v376_v15, %v320_v21 }
 0x107   :  { %v487_v24 = vpack.c.bf16 %v422_v20, %v420_v19  ;;  %v408_v27 = vadd.f32 %v376_v15, %v322_v22  ;;  %v510_v15 = vpop.permute.xlu0 %509 }
 0x108   :  { %1337 = vmatprep.subr.bf16.mxu1 %v483_v23  ;;  %v423_v32 = vmax.f32 %v407_v25, 0.0 }
 0x109   :  { %v326_v28 = vpop.f32.mrb[6].mxu0  ;;  %1338 = vmatpush3.bf16.msra.mxu1 %v483_v23  ;;  %v424_v34 = vmax.f32 %v408_v27, 0.0  ;;  %v525_v18 = vpop.permute.xlu1 %524 }
 0x10a   :  { %v409_v29 = vadd.f32 %v381_v26, %v326_v28  ;;  %v328_v30 = vpop.f32.mrb[7].mxu0 }
 0x10b   :  { %v410_v31 = vadd.f32 %v381_v26, %v328_v30  ;;  %v520_v17 = vpop.permute.xlu0 %519 }
 0x10c   :  { %v425_v33 = vmax.f32 %v409_v29, 0.0 }
 0x10d   :  { %v426_v35 = vmax.f32 %v410_v31, 0.0  ;;  %v332_v36 = vpop.f32.mrb[8].mxu0  ;;  %v535_v20 = vpop.permute.xlu1 %534 }
 0x10e   :  { %v484_v37 = vpack.c.bf16 %v425_v33, %v423_v32  ;;  %v334_v38 = vpop.f32.mrb[9].mxu0  ;;  %v411_v41 = vadd.f32 %v386_v39, %v332_v36 }
 0x10f   :  { %v488_v40 = vpack.c.bf16 %v426_v35, %v424_v34  ;;  %v412_v43 = vadd.f32 %v386_v39, %v334_v38  ;;  %v530_v19 = vpop.permute.xlu0 %529 }
 0x110   :  { %1339 = vmatprep.subr.bf16.mxu1 %v484_v37  ;;  %v427_v48 = vmax.f32 %v411_v41, 0.0 }
 0x111   :  { %v338_v44 = vpop.f32.mrb[10].mxu0  ;;  %1340 = vmatpush3.bf16.msra.mxu1 %v484_v37  ;;  %v428_v50 = vmax.f32 %v412_v43, 0.0  ;;  %v545_v25 = vpop.permute.xlu1 %544 }
 0x112   :  { %v413_v45 = vadd.f32 %v391_v42, %v338_v44  ;;  %v340_v46 = vpop.f32.mrb[11].mxu0 }
 0x113   :  { %v414_v47 = vadd.f32 %v391_v42, %v340_v46  ;;  %v540_v21 = vpop.permute.xlu0 %539 }
 0x114   :  { %v429_v49 = vmax.f32 %v413_v45, 0.0 }
 0x115   :  { %v430_v51 = vmax.f32 %v414_v47, 0.0  ;;  %v344_v52 = vpop.f32.mrb[12].mxu0  ;;  %v555_v37 = vpop.permute.xlu1 %554 }
 0x116   :  { %v485_v53 = vpack.c.bf16 %v429_v49, %v427_v48  ;;  %v346_v54 = vpop.f32.mrb[13].mxu0  ;;  %v415_v57 = vadd.f32 %v396_v55, %v344_v52 }
 0x117   :  { %v489_v56 = vpack.c.bf16 %v430_v51, %v428_v50  ;;  %v416_v59 = vadd.f32 %v396_v55, %v346_v54  ;;  %v550_v33 = vpop.permute.xlu0 %549 }
 0x118   :  { %1341 = vmatprep.subr.bf16.mxu1 %v485_v53  ;;  %v431_v0 = vmax.f32 %v415_v57, 0.0 }
 0x119   :  { %v350_v60 = vpop.f32.mrb[14].mxu0  ;;  %1342 = vmatpush3.bf16.msra.mxu1 %v485_v53  ;;  %v432_v3 = vmax.f32 %v416_v59, 0.0  ;;  %v565_v50 = vpop.permute.xlu1 %564 }
 0x11a   :  { %v417_v61 = vadd.f32 %v401_v58, %v350_v60  ;;  %v352_v62 = vpop.f32.mrb[15].mxu0 }
 0x11b   :  { %v418_v63 = vadd.f32 %v401_v58, %v352_v62  ;;  %v560_v46 = vpop.permute.xlu0 %559 }
 0x11c   :  { %v433_v2 = vmax.f32 %v417_v61, 0.0 }
 0x11d   :  { %v434_v4 = vmax.f32 %v418_v63, 0.0  ;;  %v575_v63 = vpop.permute.xlu1 %574 }
 0x11e   :  { %v486_v5 = vpack.c.bf16 %v433_v2, %v431_v0 }
 0x11f   :  { %v490_v6 = vpack.c.bf16 %v434_v4, %v432_v3  ;;  %v570_v58 = vpop.permute.xlu0 %569 }
 0x120   :  { %1343 = vmatprep.subr.bf16.mxu1 %v486_v5 }
 0x121   :  { %1344 = vmatpush3.bf16.msra.mxu1 %v486_v5 }
 0x122   :  { %1345 = vmatprep.subr.bf16.mxu1 %v487_v24 }
 0x125   :  { %1346 = vmatpush3.bf16.msra.mxu1 %v487_v24 }
 0x126   :  { %1347 = vmatprep.subr.bf16.mxu1 %v488_v40 }
 0x129   :  { %1348 = vmatpush3.bf16.msra.mxu1 %v488_v40 }
 0x12a   :  { %1349 = vmatprep.subr.bf16.mxu1 %v489_v56 }
 0x12d   :  { %1350 = vmatpush3.bf16.msra.mxu1 %v489_v56 }
 0x12e   :  { %1351 = vmatprep.subr.bf16.mxu1 %v490_v6 }
 0x131   :  { %1352 = vmatpush3.bf16.msra.mxu1 %v490_v6 }
 0x134   :  { %1354 = vmatmul.mubr.bf16.vlgmr.msra.gmra.mrb[0].mxu1 %v1486_v7  ;;  %v580_v7 = vpop.permute.xlu0 %579 }
 0x135   :  { %1357 = vmatprep.mubr.bf16.mxu1 %v1487_v8 }
 0x13c   :  { %1358 = vmatmul.mubr.bf16.gmra.mrb[4].mxu1 %v1488_v9 }
 0x13d   :  { %1361 = vmatprep.mubr.bf16.mxu1 %v1489_v10 }
 0x144   :  { %1362 = vmatmul.mubr.bf16.gmra.mrb[8].mxu1 %v1490_v11 }
 0x145   :  { %1365 = vmatprep.mubr.bf16.mxu1 %v1491_v12  ;;  %v585_v12 = vpop.permute.xlu1 %584 }
 0x14c   :  { %1366 = vmatmul.mubr.bf16.gmra.mrb[12].mxu1 %v1492_v13 }
 0x14d   :  { %1385 = vmatprep.mubr.bf16.mxu1 %v1493_v14 }
 0x207   :  { %v1355_v22 = vpop.f32.mrb[0].mxu1 }
 0x208   :  { %v678_v23 = vadd.f32 %v1355_v22, %v520_v17  ;;  %v669_v24 = vpop.f32.mrb[1].mxu1 }
 0x209   :  { %v670_v26 = vadd.f32 %v669_v24, %v510_v15  ;;  %v1356_v27 = vpop.f32.mrb[2].mxu1  ;;  %v1494_v24 = vld [vmem:[%s1850_s5 + $0x48] sm:$0xff]  }
 0x20a   :  { %v681_v28 = vadd.f32 %v1356_v27, %v525_v18  ;;  %v672_v29 = vpop.f32.mrb[3].mxu1  ;;  %v734_v31 = vmax.f32 %v678_v23, 0.0  ;;  %v1497_v27 = vld [vmem:[%s1850_s5 + $0x60] sm:$0xff]  }
 0x20b   :  { %v673_v30 = vadd.f32 %v672_v29, %v515_v16  ;;  %v732_v34 = vmax.f32 %v670_v26, 0.0  ;;  %v1496_v26 = vld [vmem:[%s1850_s5 + $0x58] sm:$0xff]   ;;  %v1499_v29 = vld [vmem:[%s1850_s5 + $0x70] sm:$0xff]  }
 0x20c   :  { %v735_v32 = vmax.f32 %v681_v28, 0.0  ;;  %v1498_v28 = vld [vmem:[%s1850_s5 + $0x68] sm:$0xff]  }
 0x20d   :  { %v733_v35 = vmax.f32 %v673_v30, 0.0  ;;  %v1500_v30 = vld [vmem:[%s1850_s5 + $0x78] sm:$0xff]  }
 0x20e   :  { %v766_v36 = vpack.c.bf16 %v735_v32, %v734_v31  ;;  %v1511_v31 = vmov 0.0|0.0   ;;  %v793_v32 = vpop.permute.xlu0 %792 }
 0x20f   :  { %v765_v38 = vpack.c.bf16 %v733_v35, %v732_v34  ;;  %v1359_v39 = vpop.f32.mrb[4].mxu1  ;;  %1439 = vmatprep.subr.bf16.mxu0 %v1511_v31 }
 0x210   :  { %v694_v40 = vadd.f32 %v1359_v39, %v540_v21  ;;  %v685_v41 = vpop.f32.mrb[5].mxu1 }
 0x211   :  { %v686_v42 = vadd.f32 %v685_v41, %v530_v19  ;;  %v1360_v43 = vpop.f32.mrb[6].mxu1  ;;  %1369 = vmatprep.subr.bf16.mxu1 %v765_v38 }
 0x212   :  { %v697_v44 = vadd.f32 %v1360_v43, %v545_v25  ;;  %v688_v45 = vpop.f32.mrb[7].mxu1  ;;  %1370 = vmatpush3.bf16.msra.mxu1 %v765_v38  ;;  %v738_v48 = vmax.f32 %v694_v40, 0.0  ;;  %v1495_v25 = vld [vmem:[%s1850_s5 + $0x50] sm:$0xff]   ;;  %v803_v34 = vpop.permute.xlu0 %802 }
 0x213   :  { %v689_v47 = vadd.f32 %v688_v45, %v535_v20  ;;  %1371 = vmatprep.subr.bf16.mxu1 %v766_v36  ;;  %v736_v51 = vmax.f32 %v686_v42, 0.0 }
 0x214   :  { %v739_v49 = vmax.f32 %v697_v44, 0.0 }
 0x215   :  { %v737_v52 = vmax.f32 %v689_v47, 0.0 }
 0x216   :  { %v768_v53 = vpack.c.bf16 %v739_v49, %v738_v48  ;;  %1372 = vmatpush3.bf16.msra.mxu1 %v766_v36  ;;  %v813_v36 = vpop.permute.xlu0 %812 }
 0x217   :  { %v767_v54 = vpack.c.bf16 %v737_v52, %v736_v51  ;;  %v1363_v55 = vpop.f32.mrb[8].mxu1 }
 0x218   :  { %v710_v56 = vadd.f32 %v1363_v55, %v560_v46  ;;  %v701_v57 = vpop.f32.mrb[9].mxu1 }
 0x219   :  { %v702_v59 = vadd.f32 %v701_v57, %v550_v33  ;;  %v1364_v60 = vpop.f32.mrb[10].mxu1  ;;  %1373 = vmatprep.subr.bf16.mxu1 %v767_v54  ;;  %v798_v33 = vpop.permute.xlu1 %797 }
 0x21a   :  { %v713_v61 = vadd.f32 %v1364_v60, %v565_v50  ;;  %v704_v62 = vpop.f32.mrb[11].mxu1  ;;  %1374 = vmatpush3.bf16.msra.mxu1 %v767_v54  ;;  %v742_v2 = vmax.f32 %v710_v56, 0.0  ;;  %v823_v38 = vpop.permute.xlu0 %822 }
 0x21b   :  { %v705_v0 = vadd.f32 %v704_v62, %v555_v37  ;;  %1375 = vmatprep.subr.bf16.mxu1 %v768_v53  ;;  %v740_v4 = vmax.f32 %v702_v59, 0.0 }
 0x21c   :  { %v743_v3 = vmax.f32 %v713_v61, 0.0 }
 0x21d   :  { %v741_v5 = vmax.f32 %v705_v0, 0.0  ;;  %v808_v35 = vpop.permute.xlu1 %807 }
 0x21e   :  { %v770_v6 = vpack.c.bf16 %v743_v3, %v742_v2  ;;  %1376 = vmatpush3.bf16.msra.mxu1 %v768_v53  ;;  %v833_v50 = vpop.permute.xlu0 %832 }
 0x21f   :  { %v769_v8 = vpack.c.bf16 %v741_v5, %v740_v4  ;;  %v1367_v9 = vpop.f32.mrb[12].mxu1 }
 0x220   :  { %v726_v10 = vadd.f32 %v1367_v9, %v580_v7  ;;  %v717_v11 = vpop.f32.mrb[13].mxu1 }
 0x221   :  { %v718_v13 = vadd.f32 %v717_v11, %v570_v58  ;;  %v1368_v14 = vpop.f32.mrb[14].mxu1  ;;  %1377 = vmatprep.subr.bf16.mxu1 %v769_v8  ;;  %v818_v37 = vpop.permute.xlu1 %817 }
 0x222   :  { %v729_v15 = vadd.f32 %v1368_v14, %v585_v12  ;;  %v720_v16 = vpop.f32.mrb[15].mxu1  ;;  %1378 = vmatpush3.bf16.msra.mxu1 %v769_v8  ;;  %v746_v18 = vmax.f32 %v726_v10, 0.0 }
 0x223   :  { %v721_v17 = vadd.f32 %v720_v16, %v575_v63  ;;  %1379 = vmatprep.subr.bf16.mxu1 %v770_v6  ;;  %v744_v20 = vmax.f32 %v718_v13, 0.0  ;;  %v843_v63 = vpop.permute.xlu0 %842 }
 0x224   :  { %v747_v19 = vmax.f32 %v729_v15, 0.0 }
 0x225   :  { %v745_v21 = vmax.f32 %v721_v17, 0.0  ;;  %v828_v42 = vpop.permute.xlu1 %827 }
 0x226   :  { %v772_v22 = vpack.c.bf16 %v747_v19, %v746_v18  ;;  %1380 = vmatpush3.bf16.msra.mxu1 %v770_v6 }
 0x227   :  { %v771_v23 = vpack.c.bf16 %v745_v21, %v744_v20  ;;  %v853_v12 = vpop.permute.xlu0 %852 }
 0x229   :  { %1381 = vmatprep.subr.bf16.mxu1 %v771_v23  ;;  %v838_v54 = vpop.permute.xlu1 %837 }
 0x22a   :  { %1382 = vmatpush3.bf16.msra.mxu1 %v771_v23  ;;  %v1031_v23 = vld [vmem:[%s1851_s7] sm:$0x7] }
 0x22b   :  { %1383 = vmatprep.subr.bf16.mxu1 %v772_v22 }
 0x22d   :  { %v848_v4 = vpop.permute.xlu1 %847 }
 0x22e   :  { %1384 = vmatpush3.bf16.msra.mxu1 %v772_v22 }
 0x231   :  { %1386 = vmatmul.mubr.bf16.vlgmr.msra.gmra.mrb[16].mxu1 %v1494_v24  ;;  %v858_v17 = vpop.permute.xlu1 %857 }
 0x232   :  { %1389 = vmatprep.mubr.bf16.mxu1 %v1495_v25  ;;  %v863_v25 = vpop.permute.xlu0 %862 }
 0x239   :  { %1390 = vmatmul.mubr.bf16.gmra.mrb[20].mxu1 %v1496_v26 }
 0x23a   :  { %1393 = vmatprep.mubr.bf16.mxu1 %v1497_v27 }
 0x241   :  { %1394 = vmatmul.mubr.bf16.gmra.mrb[24].mxu1 %v1498_v28 }
 0x242   :  { %1397 = vmatprep.mubr.bf16.mxu1 %v1499_v29 }
 0x249   :  { %1398 = vmatmul.mubr.bf16.gmra.mrb[28].mxu1 %v1500_v30  ;;  %v868_v30 = vpop.permute.xlu1 %867 }
 0x304   :  { %v1387_v39 = vpop.f32.mrb[16].mxu1 }
 0x305   :  { %v961_v40 = vadd.f32 %v1387_v39, %v803_v34  ;;  %v952_v41 = vpop.f32.mrb[17].mxu1 }
 0x306   :  { %v953_v43 = vadd.f32 %v952_v41, %v793_v32  ;;  %v1388_v44 = vpop.f32.mrb[18].mxu1 }
 0x307   :  { %v964_v45 = vadd.f32 %v1388_v44, %v808_v35  ;;  %v955_v46 = vpop.f32.mrb[19].mxu1  ;;  %v1017_v48 = vmax.f32 %v961_v40, 0.0 }
 0x308   :  { %v956_v47 = vadd.f32 %v955_v46, %v798_v33  ;;  %v1015_v51 = vmax.f32 %v953_v43, 0.0 }
 0x309   :  { %v1018_v49 = vmax.f32 %v964_v45, 0.0 }
 0x30a   :  { %v1016_v52 = vmax.f32 %v956_v47, 0.0 }
 0x30b   :  { %v1443_v53 = vpack.c.bf16 %v1018_v49, %v1017_v48 }
 0x30c   :  { %v1440_v55 = vpack.c.bf16 %v1016_v52, %v1015_v51  ;;  %v1391_v56 = vpop.f32.mrb[20].mxu1 }
 0x30d   :  { %v977_v57 = vadd.f32 %v1391_v56, %v823_v38  ;;  %v968_v58 = vpop.f32.mrb[21].mxu1 }
 0x30e   :  { %v969_v59 = vadd.f32 %v968_v58, %v813_v36  ;;  %v1392_v60 = vpop.f32.mrb[22].mxu1  ;;  %1441 = vmatpush3.bf16.msra.mxu0 %v1440_v55 }
 0x30f   :  { %v980_v61 = vadd.f32 %v1392_v60, %v828_v42  ;;  %v971_v62 = vpop.f32.mrb[23].mxu1  ;;  %1442 = vmatprep.subr.bf16.mxu0 %v1511_v31  ;;  %v1021_v2 = vmax.f32 %v977_v57, 0.0 }
 0x310   :  { %v972_v0 = vadd.f32 %v971_v62, %v818_v37  ;;  %v1019_v5 = vmax.f32 %v969_v59, 0.0 }
 0x311   :  { %v1022_v3 = vmax.f32 %v980_v61, 0.0 }
 0x312   :  { %v1020_v6 = vmax.f32 %v972_v0, 0.0  ;;  %1444 = vmatpush3.bf16.msra.mxu0 %v1443_v53 }
 0x313   :  { %v1449_v7 = vpack.c.bf16 %v1022_v3, %v1021_v2  ;;  %1445 = vmatprep.subr.bf16.mxu0 %v1511_v31 }
 0x314   :  { %v1446_v8 = vpack.c.bf16 %v1020_v6, %v1019_v5  ;;  %v1395_v9 = vpop.f32.mrb[24].mxu1 }
 0x315   :  { %v993_v10 = vadd.f32 %v1395_v9, %v843_v63  ;;  %v984_v11 = vpop.f32.mrb[25].mxu1 }
 0x316   :  { %v985_v13 = vadd.f32 %v984_v11, %v833_v50  ;;  %v1396_v14 = vpop.f32.mrb[26].mxu1  ;;  %1447 = vmatpush3.bf16.msra.mxu0 %v1446_v8 }
 0x317   :  { %v996_v15 = vadd.f32 %v1396_v14, %v848_v4  ;;  %v987_v16 = vpop.f32.mrb[27].mxu1  ;;  %1448 = vmatprep.subr.bf16.mxu0 %v1511_v31  ;;  %v1025_v19 = vmax.f32 %v993_v10, 0.0 }
 0x318   :  { %v988_v18 = vadd.f32 %v987_v16, %v838_v54  ;;  %v1023_v21 = vmax.f32 %v985_v13, 0.0 }
 0x319   :  { %v1026_v20 = vmax.f32 %v996_v15, 0.0 }
 0x31a   :  { %v1024_v22 = vmax.f32 %v988_v18, 0.0  ;;  %1450 = vmatpush3.bf16.msra.mxu0 %v1449_v7 }
 0x31b   :  { %v1455_v24 = vpack.c.bf16 %v1026_v20, %v1025_v19  ;;  %1451 = vmatprep.subr.bf16.mxu0 %v1511_v31 }
 0x31c   :  { %v1452_v26 = vpack.c.bf16 %v1024_v22, %v1023_v21  ;;  %v1399_v27 = vpop.f32.mrb[28].mxu1 }
 0x31d   :  { %v1009_v28 = vadd.f32 %v1399_v27, %v863_v25  ;;  %v1000_v29 = vpop.f32.mrb[29].mxu1  ;;  %1418 = vmatmul.mubr.msk.f32.vlgmr.msra.gmra.mrb[16].mxu0 %vm1038_vm5, %v1031_v23 }
 0x31e   :  { %v1001_v32 = vadd.f32 %v1000_v29, %v853_v12  ;;  %v1400_v33 = vpop.f32.mrb[30].mxu1  ;;  %1453 = vmatpush3.bf16.msra.mxu0 %v1452_v26  ;;  %1436 = vmatprep.mubr.msk.f32.mxu0 %vm1512_vm4, %v1509_v1  ;;  %v1036_v1 = vpop.permute.xlu0 %1035 }
 0x31f   :  { %v1012_v34 = vadd.f32 %v1400_v33, %v868_v30  ;;  %v1003_v35 = vpop.f32.mrb[31].mxu1  ;;  %1454 = vmatprep.subr.bf16.mxu0 %v1511_v31  ;;  %v1029_v37 = vmax.f32 %v1009_v28, 0.0 }
 0x320   :  { %v1004_v36 = vadd.f32 %v1003_v35, %v858_v17  ;;  %v1027_v39 = vmax.f32 %v1001_v32, 0.0 }
 0x321   :  { %v1030_v38 = vmax.f32 %v1012_v34, 0.0 }
 0x322   :  { %v1028_v40 = vmax.f32 %v1004_v36, 0.0  ;;  %1456 = vmatpush3.bf16.msra.mxu0 %v1455_v24 }
 0x323   :  { %v1461_v41 = vpack.c.bf16 %v1030_v38, %v1029_v37  ;;  %1457 = vmatprep.subr.bf16.mxu0 %v1511_v31 }
 0x324   :  { %v1458_v42 = vpack.c.bf16 %v1028_v40, %v1027_v39 }
 0x326   :  { %1459 = vmatpush3.bf16.msra.mxu0 %v1458_v42 }
 0x327   :  { %1460 = vmatprep.subr.bf16.mxu0 %v1511_v31 }
 0x32a   :  { %1462 = vmatpush3.bf16.msra.mxu0 %v1461_v41 }
 0x32d   :  { %1437 = vmatmul.mubr.msk.f32.vlgmr.msra.gmra.mrb[18].mxu0 %vm1038_vm5, %v1031_v23 }
 0x3f0   :  { %v1108_v43 = vpop.f32.mrb[16].mxu0 }
 0x3f1   :  { %v1109_v44 = vadd.f32 %v1108_v43, %v1036_v1  ;;  %v1419_v45 = vpop.f32.mrb[17].mxu0 }
 0x3f3   :  { %v1113_v46 = vmin.f32 %v1109_v44, 20.0  ;;  %vm1112_vm7 = vcmp.gt.f32.partialorder %v1109_v44, 20.0 }
 0x3f5   :  { %v1114_v47 = vmul.f32 1.442695, %v1113_v46 }
 0x3f7   :  { %1501 = vpow2.f32 %v1114_v47 }
 0x400   :  { %v1193_v48 = vpop.f32.mrb[18].mxu0 }
 0x401   :  { %v1502_v49 = vpop.eup %1501  ;;  %v1194_v50 = vadd.f32 %v1193_v48, %v1036_v1  ;;  %v1438_v51 = vpop.f32.mrb[19].mxu0 }
 0x402   :  { %v1116_v52 = vadd.f32 1.0, %v1502_v49  ;;  %v1119_v55 = vmul.f32 -0.5, %v1502_v49  ;;  %v1122_v56 = vand.u32 2147483647, %v1502_v49 }
 0x403   :  { %v1198_v53 = vmin.f32 %v1194_v50, 20.0  ;;  %vm1197_vm9 = vcmp.gt.f32.partialorder %v1194_v50, 20.0 }
 0x404   :  { %1503 = vlog2.f32 %v1116_v52  ;;  %v1120_v31 = vadd.f32 1.0, %v1119_v55  ;;  %vm1123_vm6 = vcmp.lt.f32.partialorder %v1122_v56, 0.0004427343 }
 0x405   :  { %v1199_v54 = vmul.f32 1.442695, %v1198_v53 }
 0x406   :  { %v1121_v59 = vmul.f32 %v1502_v49, %v1120_v31 }
 0x407   :  { %1505 = vpow2.f32 %v1199_v54 }
 0x40e   :  { %v1504_v57 = vpop.eup %1503 }
 0x40f   :  { %v1118_v58 = vmul.f32 0.6931472, %v1504_v57 }
 0x411   :  { %v1506_v60 = vpop.eup %1505  ;;  %v1124_v61 = vsel %vm1123_vm6, %v1121_v59, %v1118_v58 }
 0x412   :  { %v1125_v62 = vsel %vm1112_vm7, %v1109_v44, %v1124_v61  ;;  %v1201_v63 = vadd.f32 1.0, %v1506_v60  ;;  %v1204_v0 = vmul.f32 -0.5, %v1506_v60  ;;  %v1207_v3 = vand.u32 2147483647, %v1506_v60 }
 0x413   :  { %1126 = vst [vmem:[%s1852_s9] sm:$0x7] %v1125_v62 }
 0x414   :  { %1507 = vlog2.f32 %v1201_v63  ;;  %v1205_v2 = vadd.f32 1.0, %v1204_v0  ;;  %vm1208_vm8 = vcmp.lt.f32.partialorder %v1207_v3, 0.0004427343 }
 0x416   :  { %v1206_v6 = vmul.f32 %v1506_v60, %v1205_v2 }
 0x41e   :  { %v1508_v4 = vpop.eup %1507 }
 0x41f   :  { %v1203_v5 = vmul.f32 0.6931472, %v1508_v4 }
 0x421   :  { %v1209_v7 = vsel %vm1208_vm8, %v1206_v6, %v1203_v5 }
 0x422   :  { %v1210_v8 = vsel %vm1197_vm9, %v1194_v50, %v1209_v7 }
 0x423   :  { %1211 = vst [vmem:[%s1852_s9 + $0x4] sm:$0x7] %v1210_v8 }

</bundles_post_ra>
